<compile_context>
chip_gen: v7x
topology: tpu7x:2x2x1
jax: 0.10.0
libtpu: 0.0.40
codegen_flags: <defaults>
</compile_context>

<pallas_src>
import jax
import jax.numpy as jnp
from jax import lax
from jax.experimental import pallas as pl
from jax.experimental.pallas import tpu as pltpu

IN_FEATURES = 7
CHUNK = 512  # lanes per inner-loop step (multiple of 128)


def _round_up(n, m):
    return ((n + m - 1) // m) * m


def make_mlp_kernel(layer_dims, bias_offsets, tb, chunk):
    """Build the kernel with static layer sizes / packed-bias offsets baked in."""
    d1, d2, d3, d4 = layer_dims
    o1, o2, o3, o4 = bias_offsets
    n_chunks = tb // chunk

    def kernel(x_ref, w1_ref, w2_ref, w3_ref, w4_ref, b_ref, o_ref):
        # Tiny weights / biases are full-block VMEM residents: load once.
        w1 = w1_ref[...]                                    # [d1, 7]
        w2 = w2_ref[...]                                    # [d2, d1]
        w3 = w3_ref[...]                                    # [d3, d2]
        w4 = w4_ref[...]                                    # [d4, d3]
        # Hoist bias broadcasts out of the chunk loop (JAX does not CSE them).
        b1 = jnp.broadcast_to(b_ref[o1:o1 + d1, :], (d1, chunk))
        b2 = jnp.broadcast_to(b_ref[o2:o2 + d2, :], (d2, chunk))
        b3 = jnp.broadcast_to(b_ref[o3:o3 + d3, :], (d3, chunk))
        b4 = jnp.broadcast_to(b_ref[o4:o4 + d4, :], (d4, chunk))

        def body(c, carry):
            off = pl.multiple_of(c * chunk, chunk)
            xc = x_ref[pl.ds(off, chunk), :]                # [chunk, 7]
            # Layer 1: contract the 7-feature axis of both operands directly so
            # the batch axis stays on the 128-lane axis (no explicit transpose).
            h = lax.dot_general(w1, xc, (((1,), (1,)), ((), ())),
                                preferred_element_type=jnp.float32)   # [d1, chunk]
            h = jnp.maximum(h + b1, 0.0)
            h = jnp.maximum(
                jnp.dot(w2, h, preferred_element_type=jnp.float32) + b2, 0.0)
            h = jnp.maximum(
                jnp.dot(w3, h, preferred_element_type=jnp.float32) + b3, 0.0)
            out = jnp.dot(w4, h, preferred_element_type=jnp.float32) + b4
            o_ref[:, pl.ds(off, chunk)] = out.astype(o_ref.dtype)     # lane-dense
            return carry

        lax.fori_loop(0, n_chunks, body, None, unroll=True)

    return kernel


def pack_biases(params, layer_dims):
    """Pack b1..b4 into one [total, 1] buffer (single DMA instead of four).

    Each segment is padded to a multiple of 8 rows so static in-kernel slices
    stay sublane-tile aligned.
    """
    segs, offsets, off = [], [], 0
    for i, d in enumerate(layer_dims):
        offsets.append(off)
        seg = params[f"b{i + 1}"].reshape(d, 1).astype(jnp.float32)
        pad = (-d) % 8
        if pad:
            seg = jnp.concatenate([seg, jnp.zeros((pad, 1), jnp.float32)], axis=0)
        segs.append(seg)
        off += d + pad
    return jnp.concatenate(segs, axis=0), tuple(offsets)


def neural_network_forward(x, params, h_size, *, tb_max=8192, chunk=CHUNK):
    """x: [B, ...] flattening to 7 features. Returns logits [B, 1] (PyTorch layout)."""
    layer_dims = (h_size, h_size // 2, h_size // 4, 1)

    # nn.Flatten(): collapse everything after the batch dim (metadata-only for
    # contiguous inputs — no extra HBM pass over x).
    B = x.shape[0]
    x2d = x.reshape(B, -1).astype(jnp.float32)
    assert x2d.shape[1] == IN_FEATURES, "flattened feature count must be 7"

    # Batch tile: as large as tb_max to amortize per-grid-step overhead, but
    # capped near B/2 so big batches still give >= 2 grid steps (v7x: 2 TCs).
    if B <= chunk:
        tb = chunk
    else:
        tb = min(tb_max, _round_up(pl.cdiv(B, 2), chunk))
    grid = pl.cdiv(B, tb)
    bp = grid * tb  # padded (lane-dense) output width

    b_packed, b_offsets = pack_biases(params, layer_dims)
    kernel = make_mlp_kernel(layer_dims, b_offsets, tb, chunk)
    w1, w2, w3, w4 = params["w1"], params["w2"], params["w3"], params["w4"]

    def resident(arr):
        # Whole-array VMEM resident (block == full shape, constant index map).
        return pl.BlockSpec(arr.shape, lambda i: (0, 0))

    flops = 2 * bp * (IN_FEATURES * layer_dims[0]
                      + layer_dims[0] * layer_dims[1]
                      + layer_dims[1] * layer_dims[2]
                      + layer_dims[2] * layer_dims[3])
    bytes_accessed = int(x2d.size * 4 + bp * 4 + b_packed.size * 4
                         + sum(int(params[f"w{i}"].size) for i in range(1, 5)) * 4)

    out_t = pl.pallas_call(
        kernel,
        out_shape=jax.ShapeDtypeStruct((1, bp), jnp.float32),
        grid=(grid,),
        in_specs=[
            # Streamed batch tiles of x, read straight from the caller's [B, 7]
            # layout (no wrapper pad/transpose pass). The last partial block is
            # edge-clamped; its garbage columns are discarded below.
            pl.BlockSpec((tb, IN_FEATURES), lambda i: (i, 0)),
            resident(w1), resident(w2), resident(w3), resident(w4),
            resident(b_packed),
        ],
        out_specs=pl.BlockSpec((1, tb), lambda i: (0, i)),
        compiler_params=pltpu.CompilerParams(
            dimension_semantics=("parallel",)),  # v7x: 2 TCs share the batch grid
        cost_estimate=pl.CostEstimate(
            flops=flops, transcendentals=0, bytes_accessed=bytes_accessed),
    )(x2d, w1, w2, w3, w4, b_packed)

    # Back to PyTorch's [B, 1] logits layout; drop batch padding / garbage cols.
    return out_t[:, :B].T


def init_params(key, h_size):
    """Deterministic init mimicking nn.Linear's U(-1/sqrt(fan_in), 1/sqrt(fan_in)).

    Weights stored in PyTorch's [out, in] layout so the kernel computes W @ x_t.
    """
    dims = [(IN_FEATURES, h_size), (h_size, h_size // 2),
            (h_size // 2, h_size // 4), (h_size // 4, 1)]
    params = {}
    keys = jax.random.split(key, 2 * len(dims))
    for i, (fan_in, fan_out) in enumerate(dims):
        bound = 1.0 / jnp.sqrt(jnp.float32(fan_in))
        params[f"w{i + 1}"] = jax.random.uniform(
            keys[2 * i], (fan_out, fan_in), minval=-bound, maxval=bound,
            dtype=jnp.float32)
        params[f"b{i + 1}"] = jax.random.uniform(
            keys[2 * i + 1], (fan_out,), minval=-bound, maxval=bound,
            dtype=jnp.float32)
    return params


if __name__ == "__main__":
    key = jax.random.PRNGKey(0)
    h_size = 32
    params = init_params(key, h_size)

    # Batch not a multiple of the tile: exercises the edge-clamped last block
    # and a 2-step parallel grid, while staying small (1000 x 7 floats).
    B = 1000
    x = jax.random.normal(jax.random.fold_in(key, 123), (B, IN_FEATURES),
                          dtype=jnp.float32)

    logits = neural_network_forward(x, params, h_size)
    jax.block_until_ready(logits)

    # Pure-JAX reference of the same math ([out, in] weights, PyTorch semantics).
    h = x
    for i in range(1, 4):
        h = jnp.maximum(h @ params[f"w{i}"].T + params[f"b{i}"], 0.0)
    ref = h @ params["w4"].T + params["b4"]

    assert logits.shape == (B, 1)
    assert jnp.allclose(logits, ref, atol=1e-5), "mismatch vs JAX reference"
    print("KERNEL_OK")
</pallas_src>

<mosaic_0001>
module attributes {stable_mosaic.version = 11 : i64} {
  func.func @kernel(%arg0: i32, %arg1: memref<512x7xf32, #tpu.memory_space<vmem>>, %arg2: memref<32x7xf32, #tpu.memory_space<vmem>>, %arg3: memref<16x32xf32, #tpu.memory_space<vmem>>, %arg4: memref<8x16xf32, #tpu.memory_space<vmem>>, %arg5: memref<1x8xf32, #tpu.memory_space<vmem>>, %arg6: memref<64x1xf32, #tpu.memory_space<vmem>>, %arg7: memref<1x512xf32, #tpu.memory_space<vmem>>) attributes {dimension_semantics = [#tpu.dimension_semantics<parallel>], iteration_bounds = array<i64: 2>, scalar_prefetch = 0 : i64, scratch_operands = 0 : i64, tpu.core_type = #tpu.core_type<tc>, window_params = [{transform_indices = @transform_0, window_bounds = array<i64: 512, 7>}, {pipeline_mode = #tpu.pipeline_mode<synchronous>, transform_indices = @transform_1, window_bounds = array<i64: 32, 7>}, {pipeline_mode = #tpu.pipeline_mode<synchronous>, transform_indices = @transform_2, window_bounds = array<i64: 16, 32>}, {pipeline_mode = #tpu.pipeline_mode<synchronous>, transform_indices = @transform_3, window_bounds = array<i64: 8, 16>}, {pipeline_mode = #tpu.pipeline_mode<synchronous>, transform_indices = @transform_4, window_bounds = array<i64: 1, 8>}, {pipeline_mode = #tpu.pipeline_mode<synchronous>, transform_indices = @transform_5, window_bounds = array<i64: 64, 1>}, {transform_indices = @transform_6, window_bounds = array<i64: 1, 512>}]} {
    %c0 = arith.constant 0 : index
    %c0_0 = arith.constant 0 : index
    %0 = vector.load %arg2[%c0, %c0_0] : memref<32x7xf32, #tpu.memory_space<vmem>>, vector<32x7xf32>
    %c0_1 = arith.constant 0 : index
    %c0_2 = arith.constant 0 : index
    %1 = vector.load %arg3[%c0_1, %c0_2] : memref<16x32xf32, #tpu.memory_space<vmem>>, vector<16x32xf32>
    %c0_3 = arith.constant 0 : index
    %c0_4 = arith.constant 0 : index
    %2 = vector.load %arg4[%c0_3, %c0_4] : memref<8x16xf32, #tpu.memory_space<vmem>>, vector<8x16xf32>
    %c0_5 = arith.constant 0 : index
    %c0_6 = arith.constant 0 : index
    %3 = vector.load %arg5[%c0_5, %c0_6] : memref<1x8xf32, #tpu.memory_space<vmem>>, vector<1x8xf32>
    %c0_7 = arith.constant 0 : index
    %c0_8 = arith.constant 0 : index
    %4 = vector.load %arg6[%c0_7, %c0_8] : memref<64x1xf32, #tpu.memory_space<vmem>>, vector<32x1xf32>
    %5 = vector.shape_cast %4 : vector<32x1xf32> to vector<32x1xf32>
    %6 = vector.broadcast %5 : vector<32x1xf32> to vector<32x512xf32>
    %c32 = arith.constant 32 : index
    %c0_9 = arith.constant 0 : index
    %7 = vector.load %arg6[%c32, %c0_9] : memref<64x1xf32, #tpu.memory_space<vmem>>, vector<16x1xf32>
    %8 = vector.shape_cast %7 : vector<16x1xf32> to vector<16x1xf32>
    %9 = vector.broadcast %8 : vector<16x1xf32> to vector<16x512xf32>
    %c48 = arith.constant 48 : index
    %c0_10 = arith.constant 0 : index
    %10 = vector.load %arg6[%c48, %c0_10] : memref<64x1xf32, #tpu.memory_space<vmem>>, vector<8x1xf32>
    %11 = vector.shape_cast %10 : vector<8x1xf32> to vector<8x1xf32>
    %12 = vector.broadcast %11 : vector<8x1xf32> to vector<8x512xf32>
    %c56 = arith.constant 56 : index
    %c0_11 = arith.constant 0 : index
    %13 = vector.load %arg6[%c56, %c0_11] : memref<64x1xf32, #tpu.memory_space<vmem>>, vector<1x1xf32>
    %14 = vector.shape_cast %13 : vector<1x1xf32> to vector<1x1xf32>
    %15 = vector.broadcast %14 : vector<1x1xf32> to vector<1x512xf32>
    %c0_i32 = arith.constant 0 : i32
    %c512_i32 = arith.constant 512 : i32
    %16 = arith.muli %c0_i32, %c512_i32 : i32
    %17 = tpu.assume_multiple %16, 512 : i32
    %18 = arith.index_cast %17 : i32 to index
    %c0_12 = arith.constant 0 : index
    %19 = vector.load %arg1[%18, %c0_12] : memref<512x7xf32, #tpu.memory_space<vmem>>, vector<512x7xf32>
    %cst = arith.constant dense<0.000000e+00> : vector<32x512xf32>
    %20 = tpu.matmul %0, %19, %cst {dimension_numbers = #tpu.dot_dimension_numbers<[1], [1], [0], [0], [0, 0, 1, 0], [], []>} : vector<32x7xf32>, vector<512x7xf32>, vector<32x512xf32> -> vector<32x512xf32>
    %21 = arith.addf %20, %6 : vector<32x512xf32>
    %cst_13 = arith.constant 0.000000e+00 : f32
    %22 = vector.broadcast %cst_13 : f32 to vector<32x512xf32>
    %23 = arith.maximumf %21, %22 : vector<32x512xf32>
    %cst_14 = arith.constant dense<0.000000e+00> : vector<16x512xf32>
    %24 = tpu.matmul %1, %23, %cst_14 {dimension_numbers = #tpu.dot_dimension_numbers<[1], [0], [0], [1], [0, 0, 1, 1], [], []>} : vector<16x32xf32>, vector<32x512xf32>, vector<16x512xf32> -> vector<16x512xf32>
    %25 = arith.addf %24, %9 : vector<16x512xf32>
    %cst_15 = arith.constant 0.000000e+00 : f32
    %26 = vector.broadcast %cst_15 : f32 to vector<16x512xf32>
    %27 = arith.maximumf %25, %26 : vector<16x512xf32>
    %cst_16 = arith.constant dense<0.000000e+00> : vector<8x512xf32>
    %28 = tpu.matmul %2, %27, %cst_16 {dimension_numbers = #tpu.dot_dimension_numbers<[1], [0], [0], [1], [0, 0, 1, 1], [], []>} : vector<8x16xf32>, vector<16x512xf32>, vector<8x512xf32> -> vector<8x512xf32>
    %29 = arith.addf %28, %12 : vector<8x512xf32>
    %cst_17 = arith.constant 0.000000e+00 : f32
    %30 = vector.broadcast %cst_17 : f32 to vector<8x512xf32>
    %31 = arith.maximumf %29, %30 : vector<8x512xf32>
    %cst_18 = arith.constant dense<0.000000e+00> : vector<1x512xf32>
    %32 = tpu.matmul %3, %31, %cst_18 {dimension_numbers = #tpu.dot_dimension_numbers<[1], [0], [0], [1], [0, 0, 1, 1], [], []>} : vector<1x8xf32>, vector<8x512xf32>, vector<1x512xf32> -> vector<1x512xf32>
    %33 = arith.addf %32, %15 : vector<1x512xf32>
    %c0_19 = arith.constant 0 : index
    %34 = arith.index_cast %17 : i32 to index
    %35 = vector.load %arg7[%c0_19, %34] : memref<1x512xf32, #tpu.memory_space<vmem>>, vector<1x512xf32>
    tpu.vector_store %arg7[%c0_19, %34], %33 {strides = array<i32>} : memref<1x512xf32, #tpu.memory_space<vmem>>, vector<1x512xf32>,
    %c1_i32 = arith.constant 1 : i32
    return
  }
  func.func @transform_0(%arg0: i32) -> (i32, i32) {
    %c0_i32 = arith.constant 0 : i32
    %c0_i32_0 = arith.constant 0 : i32
    return %arg0, %c0_i32 : i32, i32
  }
  func.func @transform_1(%arg0: i32) -> (i32, i32) {
    %c0_i32 = arith.constant 0 : i32
    %c0_i32_0 = arith.constant 0 : i32
    %c0_i32_1 = arith.constant 0 : i32
    return %c0_i32, %c0_i32_0 : i32, i32
  }
  func.func @transform_2(%arg0: i32) -> (i32, i32) {
    %c0_i32 = arith.constant 0 : i32
    %c0_i32_0 = arith.constant 0 : i32
    %c0_i32_1 = arith.constant 0 : i32
    return %c0_i32, %c0_i32_0 : i32, i32
  }
  func.func @transform_3(%arg0: i32) -> (i32, i32) {
    %c0_i32 = arith.constant 0 : i32
    %c0_i32_0 = arith.constant 0 : i32
    %c0_i32_1 = arith.constant 0 : i32
    return %c0_i32, %c0_i32_0 : i32, i32
  }
  func.func @transform_4(%arg0: i32) -> (i32, i32) {
    %c0_i32 = arith.constant 0 : i32
    %c0_i32_0 = arith.constant 0 : i32
    %c0_i32_1 = arith.constant 0 : i32
    return %c0_i32, %c0_i32_0 : i32, i32
  }
  func.func @transform_5(%arg0: i32) -> (i32, i32) {
    %c0_i32 = arith.constant 0 : i32
    %c0_i32_0 = arith.constant 0 : i32
    %c0_i32_1 = arith.constant 0 : i32
    return %c0_i32, %c0_i32_0 : i32, i32
  }
  func.func @transform_6(%arg0: i32) -> (i32, i32) {
    %c0_i32 = arith.constant 0 : i32
    %c0_i32_0 = arith.constant 0 : i32
    return %c0_i32, %arg0 : i32, i32
  }
}

</mosaic_0001>

<bundles_post_ra>
// kernel: tpu_custom_call.1
= control target key start
LH: loop header
LB: loop body
LE: loop exit
PB: predicated region body
PF: predicated region fallthrough
CT: control target
= control target key end

     0   :  { %11 = vsyncpa [#allocation3], 0  ;;  %s2118_s0 = inlined_call_operand.vmem [shape: f32[1000,7], index: 0, kind: input, shape index: {}]   ;;  %s2119_s1 = inlined_call_operand.vmem [shape: f32[32,7], index: 1, kind: input, shape index: {}]   ;;  %s2120_s2 = inlined_call_operand.vmem [shape: f32[16,32], index: 2, kind: input, shape index: {}]   ;;  %s2121_s3 = inlined_call_operand.vmem [shape: f32[8,16], index: 3, kind: input, shape index: {}]   ;;  %s2122_s4 = inlined_call_operand.vmem [shape: f32[1,8], index: 4, kind: input, shape index: {}]   ;;  %s2123_s5 = inlined_call_operand.vmem [shape: f32[64,1], index: 5, kind: input, shape index: {}]   ;;  %s2124_s6 = inlined_call_operand.hbm [shape: f32[1,1024], index: 6, kind: output, shape index: {}]  }
   0x1   :  { %13 = vsyncpa [#allocation3 + $0x1], 0  ;;  %s1805_s21 = smov 0   ;;  %s1807_s22 = smov 0  }
   0x2   :  { %s1809_s23 = smov 0   ;;  %s1811_s24 = smov 0  }
   0x3 LB: > { %s1364_s25 = sadd.s32 4294967295, %s1764_s24   ;;  %s1365_s26 = sadd.s32 4294967294, %s1764_s24   ;;  %s1764_s24 = sphi %s1811_s24, %s2132_s24   ;;  %s1760_s23 = sphi %s1809_s23, %s2131_s23   ;;  %s1756_s22 = sphi %s1807_s22, %s2130_s22   ;;  %s1752_s21 = sphi %s1805_s21, %s2129_s21  }
   0x4   : > { %s1828_s27 = sadd.s32 1, %s1764_s24   ;;  %s157_s28 = sadd.s32 1, %s1760_s23 }
   0x5   : > { %s154_s29 = ssub.s32 %s1764_s24, %s1828_s27  ;;  %p167_p0 = scmp.ne.s32.totalorder %s1760_s23, %s1756_s22 }
   0x6   : > { %p155_p1 = scmp.eq.s32.totalorder %s154_s29, 0  ;;  %p168_p2 = scmp.eq.s32.totalorder %s1364_s25, 1 }
   0x7   : > { %p173_p3 = scmp.ne.s32.totalorder %s1756_s22, %s1752_s21  ;;  %p174_p4 = scmp.eq.s32.totalorder %s1365_s26, 1 }
   0x8   : > { %s1838_s30 = scalar_select %p155_p1, %s1760_s23, %s157_s28  }
   0x9   : > { %p1840_p5 = por %p168_p2, %p167_p0  ;;  %p1844_p6 = por %p174_p4, %p173_p3 }
   0xa   : > { %p1368_p7 = scmp.ge.s32.totalorder %s1764_s24, 1  ;;  %p224_p8 = scmp.lt.s32.totalorder %s1764_s24, 3 }
   0xc   : > { %p225_p9 = pnand %p1368_p7, %p224_p8 }
   0xd   : > { %s1850_s9 = sshll.u32 (!%p225_p9), %s1364_s25, 6  ;;  %vm393_vm0 = vcmask (!%p225_p9), 56320   ;;  %v1855_v0 = vld [vmem:[%s2119_s1] sm:$0xff] (!%p225_p9)  ;;  %v1766_v2 = vmov (!%p225_p9), 0   ;;  %v283_v3 = vld [vmem:[%s2123_s5 + $0x10] sm:$0xff] (!%p225_p9)  ;;  %v282_v4 = vld [vmem:[%s2123_s5 + $0x8] sm:$0xff] (!%p225_p9) }
   0xe   : > { %228 = sbr.rel (%p225_p9) target bundleno = 1012 (0x3f4), region = 44  ;;  %p263_p10 = scmp.lt.s32.totalorder (!%p225_p9), %s1850_s9, 124  ;;  %1490 = vmatprep.mubr.msk.f32.mxu0 (!%p225_p9), %vm393_vm0, %v1855_v0  ;;  %1530 = vmatprep.mubr.msk.f32.mxu1 (!%p225_p9), %vm393_vm0, %v1855_v0  ;;  %v281_v1 = vld [vmem:[%s2123_s5] sm:$0xff] (!%p225_p9)  ;;  %v284_v5 = vld [vmem:[%s2123_s5 + $0x18] sm:$0xff] (!%p225_p9)  ;;  %vm1882_vm1 = vmpackc.low (!%p225_p9), %vm393_vm0, %vm393_vm0  ;;  %v1767_v6 = vmov (!%p225_p9), 0.0   ;;  %vm792_vm2 = vcmask (!%p225_p9), 261120  }
   0xf   : > { %1700 = vset.pattern.permute.xlu0 (!%p225_p9), %v1766_v2  ;;  %1701 = vset.pattern.permute.xlu1 (!%p225_p9), %v1766_v2  ;;  %v305_v10 = vld [vmem:[%s2123_s5 + $0x20] sm:$0xff] (!%p225_p9)  ;;  %v317_v26 = vld [vmem:[%s2123_s5 + $0x30] sm:$0xff] (!%p225_p9)  ;;  %v306_v27 = vld [vmem:[%s2123_s5 + $0x28] sm:$0xff] (!%p225_p9)  ;;  %vm961_vm3 = vcmask (!%p225_p9), 130048   ;;  %vm1111_vm4 = vcmask (!%p225_p9), 64512   ;;  %s255_s17 = sand.u32 (!%p225_p9), 1, %s1756_s22   ;;  %s2076_s28 = scalar_lea.hbm (!%p225_p9), %s2124_s6, %s1850_s9 }
  0x10   : > { %287 = vperm.xlu0 (!%p225_p9), %1700, %v281_v1   ;;  %297 = vperm.xlu1 (!%p225_p9), %1701, %v283_v3   ;;  %v323_v37 = vld [vmem:[%s2123_s5 + $0x38] sm:$0x1] (!%p225_p9)  ;;  %s1369_s18 = sshll.u32 (!%p225_p9), %s255_s17, 2  ;;  %s1769_s11 = smov (!%p225_p9), [#allocation2]  }
  0x11   : > { %s257_s19 = scalar_lea.vmem (!%p225_p9), [#allocation2], %s1369_s18  ;;  %s1706_s12 = sshll.u32 (!%p225_p9), %s1769_s11, 4  ;;  %s1707_s12 = int_to_ptr.vmem [resolvable:$false] %s1706_s12 }
  0x12   : > { %s1306_s20 = sshll.u32 (!%p225_p9), %s257_s19, 4  ;;  %s1708_s13 = scalar_lea.vmem (!%p225_p9), %s1707_s12, 128  ;;  %s2078_s20 = int_to_ptr.vmem [resolvable:$true] %s1306_s20 }
  0x13   : > { %s1702_s10 = scalar_lea.vmem (!%p225_p9), %s2078_s20, 64  ;;  %p1709_p0 = scmp.lt.s32.totalorder (!%p225_p9), %s2078_s20, %s1707_s12 }
  0x14   : > { %292 = vperm.xlu0 (!%p225_p9), %1700, %v282_v4   ;;  %302 = vperm.xlu1 (!%p225_p9), %1701, %v284_v5   ;;  %p1703_p11 = scmp.ne.s32.totalorder (!%p225_p9), %s2078_s20, %s1702_s10  ;;  %p1710_p1 = scmp.lt.s32.totalorder (!%p225_p9), %s1708_s13, %s1702_s10 }
  0x15   : > { %s264_s16 = scalar_select %p263_p10, %s1850_s9, 124 }
  0x16   : > { %p1704_p12 = pnand %p1703_p11, %p1840_p5  ;;  %p1711_p2 = por %p1710_p1, %p1709_p0 }
  0x17   : > { %s1371_s25 = sshll.u32 %s264_s16, 3 }
  0x18   : > { %s1878_s29 = scalar_lea.vmem %s2118_s0, %s1371_s25  ;;  %309 = vperm.xlu0 %1700, %v305_v10   ;;  %314 = vperm.xlu1 %1701, %v306_v27   ;;  %p1705_p13 = pneg %p1704_p12 }
  0x19   : > { %v345_v7 = vld [vmem:[%s1878_s29 + $0x80] sm:$0xff]  ;;  %v346_v8 = vld [vmem:[%s1878_s29 + $0x88] sm:$0xff]  ;;  %v347_v19 = vld [vmem:[%s1878_s29 + $0x90] sm:$0xff] }
  0x1a   : > { %v377_v9 = vld [vmem:[%s1878_s29 + $0x180] sm:$0xff]  ;;  %v1538_v11 = vpack.c.bf16 %v346_v8, %v345_v7  ;;  %v378_v12 = vld [vmem:[%s1878_s29 + $0x188] sm:$0xff]  ;;  %v348_v21 = vld [vmem:[%s1878_s29 + $0x98] sm:$0xff]  ;;  %p1712_p3 = pnand %p1711_p2, %p1705_p13 }
  0x1b   : > { %v329_v13 = vld [vmem:[%s1878_s29] sm:$0xff]  ;;  %v330_v14 = vld [vmem:[%s1878_s29 + $0x8] sm:$0xff]  ;;  %v1586_v15 = vpack.c.bf16 %v378_v12, %v377_v9  ;;  %v379_v22 = vld [vmem:[%s1878_s29 + $0x190] sm:$0xff]  ;;  %v1544_v24 = vpack.c.bf16 %v348_v21, %v347_v19 }
  0x1c   : > { %v1541_v16 = vpack.c.bf16 %v330_v14, %v329_v13  ;;  %v361_v17 = vld [vmem:[%s1878_s29 + $0x100] sm:$0xff]  ;;  %v362_v18 = vld [vmem:[%s1878_s29 + $0x108] sm:$0xff]  ;;  %1540 = vmatprep.subr.msk.bf16.mxu0 %vm1882_vm1, %v1538_v11  ;;  %v380_v23 = vld [vmem:[%s1878_s29 + $0x198] sm:$0xff]  ;;  %320 = vperm.xlu0 %1700, %v317_v26  }
  0x1d   : > { %v1589_v20 = vpack.c.bf16 %v362_v18, %v361_v17  ;;  %1588 = vmatprep.subr.msk.bf16.mxu1 %vm1882_vm1, %v1586_v15  ;;  %v1592_v25 = vpack.c.bf16 %v380_v23, %v379_v22  ;;  %v331_v28 = vld [vmem:[%s1878_s29 + $0x10] sm:$0xff]  ;;  %v332_v29 = vld [vmem:[%s1878_s29 + $0x18] sm:$0xff]  ;;  %v349_v32 = vld [vmem:[%s1878_s29 + $0xa0] sm:$0xff]  ;;  %326 = vperm.xlu1 %1701, %v323_v37  }
  0x1e   : > { %1543 = vmatpush3.bf16.xpose.msk.msra.mxu0 %vm1882_vm1, %v1541_v16  ;;  %v363_v30 = vld [vmem:[%s1878_s29 + $0x110] sm:$0xff]  ;;  %v364_v31 = vld [vmem:[%s1878_s29 + $0x118] sm:$0xff]  ;;  %v350_v33 = vld [vmem:[%s1878_s29 + $0xa8] sm:$0xff]  ;;  %v1547_v36 = vpack.c.bf16 %v332_v29, %v331_v28 }
  0x1f   : > { %1591 = vmatpush3.bf16.xpose.msk.msra.mxu1 %vm1882_vm1, %v1589_v20  ;;  %1546 = vmatprep.subr.msk.bf16.mxu0 %vm1882_vm1, %v1544_v24  ;;  %v381_v34 = vld [vmem:[%s1878_s29 + $0x1a0] sm:$0xff]  ;;  %v382_v35 = vld [vmem:[%s1878_s29 + $0x1a8] sm:$0xff]  ;;  %v1595_v38 = vpack.c.bf16 %v364_v31, %v363_v30  ;;  %v1550_v39 = vpack.c.bf16 %v350_v33, %v349_v32  ;;  %v351_v45 = vld [vmem:[%s1878_s29 + $0xb0] sm:$0xff] }
  0x20   : > { %1594 = vmatprep.subr.msk.bf16.mxu1 %vm1882_vm1, %v1592_v25  ;;  %v1598_v40 = vpack.c.bf16 %v382_v35, %v381_v34  ;;  %v333_v41 = vld [vmem:[%s1878_s29 + $0x20] sm:$0xff]  ;;  %v334_v42 = vld [vmem:[%s1878_s29 + $0x28] sm:$0xff]  ;;  %v352_v46 = vld [vmem:[%s1878_s29 + $0xb8] sm:$0xff] }
  0x21   : > { %v365_v43 = vld [vmem:[%s1878_s29 + $0x120] sm:$0xff]  ;;  %v366_v44 = vld [vmem:[%s1878_s29 + $0x128] sm:$0xff]  ;;  %v383_v47 = vld [vmem:[%s1878_s29 + $0x1b0] sm:$0xff]  ;;  %v1553_v49 = vpack.c.bf16 %v334_v42, %v333_v41  ;;  %v1556_v51 = vpack.c.bf16 %v352_v46, %v351_v45 }
  0x22   : > { %v384_v48 = vld [vmem:[%s1878_s29 + $0x1b8] sm:$0xff]  ;;  %v1601_v50 = vpack.c.bf16 %v366_v44, %v365_v43  ;;  %v335_v53 = vld [vmem:[%s1878_s29 + $0x30] sm:$0xff]  ;;  %v353_v57 = vld [vmem:[%s1878_s29 + $0xc0] sm:$0xff] }
  0x23   : > { %v1604_v52 = vpack.c.bf16 %v384_v48, %v383_v47  ;;  %v336_v54 = vld [vmem:[%s1878_s29 + $0x38] sm:$0xff]  ;;  %v367_v55 = vld [vmem:[%s1878_s29 + $0x130] sm:$0xff]  ;;  %v354_v58 = vld [vmem:[%s1878_s29 + $0xc8] sm:$0xff] }
  0x24   : > { %v368_v56 = vld [vmem:[%s1878_s29 + $0x138] sm:$0xff]  ;;  %v385_v59 = vld [vmem:[%s1878_s29 + $0x1c0] sm:$0xff]  ;;  %v386_v60 = vld [vmem:[%s1878_s29 + $0x1c8] sm:$0xff]  ;;  %v1559_v61 = vpack.c.bf16 %v336_v54, %v335_v53  ;;  %v1562_v63 = vpack.c.bf16 %v354_v58, %v353_v57 }
  0x25   : > { %v1607_v62 = vpack.c.bf16 %v368_v56, %v367_v55  ;;  %v1610_v1 = vpack.c.bf16 %v386_v60, %v385_v59  ;;  %v337_v2 = vld [vmem:[%s1878_s29 + $0x40] sm:$0xff]  ;;  %v338_v3 = vld [vmem:[%s1878_s29 + $0x48] sm:$0xff]  ;;  %v355_v7 = vld [vmem:[%s1878_s29 + $0xd0] sm:$0xff] }
  0x26   : > { %1549 = vmatpush3.bf16.xpose.msk.msra.mxu0 %vm1882_vm1, %v1547_v36  ;;  %v369_v4 = vld [vmem:[%s1878_s29 + $0x140] sm:$0xff]  ;;  %v370_v5 = vld [vmem:[%s1878_s29 + $0x148] sm:$0xff]  ;;  %v356_v8 = vld [vmem:[%s1878_s29 + $0xd8] sm:$0xff]  ;;  %v1565_v11 = vpack.c.bf16 %v338_v3, %v337_v2 }
  0x27   : > { %1597 = vmatpush3.bf16.xpose.msk.msra.mxu1 %vm1882_vm1, %v1595_v38  ;;  %1552 = vmatprep.subr.msk.bf16.mxu0 %vm1882_vm1, %v1550_v39  ;;  %v387_v9 = vld [vmem:[%s1878_s29 + $0x1d0] sm:$0xff]  ;;  %v388_v10 = vld [vmem:[%s1878_s29 + $0x1d8] sm:$0xff]  ;;  %v1613_v12 = vpack.c.bf16 %v370_v5, %v369_v4  ;;  %v1568_v13 = vpack.c.bf16 %v356_v8, %v355_v7  ;;  %v357_v19 = vld [vmem:[%s1878_s29 + $0xe0] sm:$0xff] }
  0x28   : > { %1600 = vmatprep.subr.msk.bf16.mxu1 %vm1882_vm1, %v1598_v40  ;;  %v1616_v14 = vpack.c.bf16 %v388_v10, %v387_v9  ;;  %v339_v15 = vld [vmem:[%s1878_s29 + $0x50] sm:$0xff]  ;;  %v340_v16 = vld [vmem:[%s1878_s29 + $0x58] sm:$0xff]  ;;  %v358_v20 = vld [vmem:[%s1878_s29 + $0xe8] sm:$0xff] }
  0x29   : > { %v371_v17 = vld [vmem:[%s1878_s29 + $0x150] sm:$0xff]  ;;  %v372_v18 = vld [vmem:[%s1878_s29 + $0x158] sm:$0xff]  ;;  %v389_v21 = vld [vmem:[%s1878_s29 + $0x1e0] sm:$0xff]  ;;  %v1571_v23 = vpack.c.bf16 %v340_v16, %v339_v15  ;;  %v1574_v25 = vpack.c.bf16 %v358_v20, %v357_v19 }
  0x2a   : > { %v390_v22 = vld [vmem:[%s1878_s29 + $0x1e8] sm:$0xff]  ;;  %v1619_v24 = vpack.c.bf16 %v372_v18, %v371_v17  ;;  %v341_v27 = vld [vmem:[%s1878_s29 + $0x60] sm:$0xff]  ;;  %v359_v31 = vld [vmem:[%s1878_s29 + $0xf0] sm:$0xff] }
  0x2b   : > { %v1622_v26 = vpack.c.bf16 %v390_v22, %v389_v21  ;;  %v342_v28 = vld [vmem:[%s1878_s29 + $0x68] sm:$0xff]  ;;  %v373_v29 = vld [vmem:[%s1878_s29 + $0x160] sm:$0xff]  ;;  %v360_v32 = vld [vmem:[%s1878_s29 + $0xf8] sm:$0xff] }
  0x2c   : > { %v374_v30 = vld [vmem:[%s1878_s29 + $0x168] sm:$0xff]  ;;  %v391_v33 = vld [vmem:[%s1878_s29 + $0x1f0] sm:$0xff]  ;;  %v392_v34 = vld [vmem:[%s1878_s29 + $0x1f8] sm:$0xff]  ;;  %v1577_v35 = vpack.c.bf16 %v342_v28, %v341_v27  ;;  %v1580_v37 = vpack.c.bf16 %v360_v32, %v359_v31 }
  0x2d   : > { %v1625_v36 = vpack.c.bf16 %v374_v30, %v373_v29  ;;  %v1628_v38 = vpack.c.bf16 %v392_v34, %v391_v33  ;;  %v343_v39 = vld [vmem:[%s1878_s29 + $0x70] sm:$0xff]  ;;  %v344_v40 = vld [vmem:[%s1878_s29 + $0x78] sm:$0xff]  ;;  %v274_v45 = vld [vmem:[%s2119_s1 + $0x8] sm:$0xff] }
  0x2e   : > { %1555 = vmatpush3.bf16.xpose.msk.msra.mxu0 %vm1882_vm1, %v1553_v49  ;;  %v375_v41 = vld [vmem:[%s1878_s29 + $0x170] sm:$0xff]  ;;  %v376_v42 = vld [vmem:[%s1878_s29 + $0x178] sm:$0xff]  ;;  %v1583_v43 = vpack.c.bf16 %v344_v40, %v343_v39  ;;  %s1292_s29 = scalar_lea.sflag [#allocation3], %s255_s17 }
  0x2f   : > { %1603 = vmatpush3.bf16.xpose.msk.msra.mxu1 %vm1882_vm1, %v1601_v50  ;;  %1558 = vmatprep.subr.msk.bf16.mxu0 %vm1882_vm1, %v1556_v51  ;;  %v1631_v44 = vpack.c.bf16 %v376_v42, %v375_v41  ;;  %v275_v46 = vld [vmem:[%s2119_s1 + $0x10] sm:$0xff] }
  0x30   : > { %1606 = vmatprep.subr.msk.bf16.mxu1 %vm1882_vm1, %v1604_v52 }
  0x36   : > { %1561 = vmatpush3.bf16.xpose.msk.msra.mxu0 %vm1882_vm1, %v1559_v61 }
  0x37   : > { %1609 = vmatpush3.bf16.xpose.msk.msra.mxu1 %vm1882_vm1, %v1607_v62  ;;  %1564 = vmatprep.subr.msk.bf16.mxu0 %vm1882_vm1, %v1562_v63 }
  0x38   : > { %1612 = vmatprep.subr.msk.bf16.mxu1 %vm1882_vm1, %v1610_v1 }
  0x3e   : > { %1567 = vmatpush3.bf16.xpose.msk.msra.mxu0 %vm1882_vm1, %v1565_v11 }
  0x3f   : > { %1615 = vmatpush3.bf16.xpose.msk.msra.mxu1 %vm1882_vm1, %v1613_v12  ;;  %1570 = vmatprep.subr.msk.bf16.mxu0 %vm1882_vm1, %v1568_v13 }
  0x40   : > { %1618 = vmatprep.subr.msk.bf16.mxu1 %vm1882_vm1, %v1616_v14 }
  0x46   : > { %1573 = vmatpush3.bf16.xpose.msk.msra.mxu0 %vm1882_vm1, %v1571_v23 }
  0x47   : > { %1621 = vmatpush3.bf16.xpose.msk.msra.mxu1 %vm1882_vm1, %v1619_v24  ;;  %1576 = vmatprep.subr.msk.bf16.mxu0 %vm1882_vm1, %v1574_v25 }
  0x48   : > { %1624 = vmatprep.subr.msk.bf16.mxu1 %vm1882_vm1, %v1622_v26 }
  0x4e   : > { %1579 = vmatpush3.bf16.xpose.msk.msra.mxu0 %vm1882_vm1, %v1577_v35 }
  0x4f   : > { %1627 = vmatpush3.bf16.xpose.msk.msra.mxu1 %vm1882_vm1, %v1625_v36  ;;  %1582 = vmatprep.subr.msk.bf16.mxu0 %vm1882_vm1, %v1580_v37 }
  0x50   : > { %1630 = vmatprep.subr.msk.bf16.mxu1 %vm1882_vm1, %v1628_v38 }
  0x56   : > { %1585 = vmatpush3.bf16.xpose.msk.msra.mxu0 %vm1882_vm1, %v1583_v43 }
  0x57   : > { %1633 = vmatpush3.bf16.xpose.msk.msra.mxu1 %vm1882_vm1, %v1631_v44 }
  0x5d   : > { %1491 = vmatmul.mubr.msk.f32.vlgmr.msra.gmra.mrb[0].mxu0 %vm393_vm0, %v1855_v0 }
  0x5e   : > { %1531 = vmatmul.mubr.msk.f32.vlgmr.msra.gmra.mrb[0].mxu1 %vm393_vm0, %v1855_v0  ;;  %1492 = vmatprep.mubr.msk.f32.mxu0 %vm393_vm0, %v274_v45  ;;  %v276_v0 = vld [vmem:[%s2119_s1 + $0x18] sm:$0xff] }
  0x5f   : > { %1532 = vmatprep.mubr.msk.f32.mxu1 %vm393_vm0, %v274_v45 }
  0x61   : > { %1493 = vmatmul.mubr.msk.f32.gmra.mrb[2].mxu0 %vm393_vm0, %v274_v45 }
  0x62   : > { %1533 = vmatmul.mubr.msk.f32.gmra.mrb[2].mxu1 %vm393_vm0, %v274_v45  ;;  %1494 = vmatprep.mubr.msk.f32.mxu0 %vm393_vm0, %v275_v46  ;;  %v277_v45 = vld [vmem:[%s2120_s2] sm:$0xff] }
  0x63   : > { %1534 = vmatprep.mubr.msk.f32.mxu1 %vm393_vm0, %v275_v46 }
  0x65   : > { %1495 = vmatmul.mubr.msk.f32.gmra.mrb[4].mxu0 %vm393_vm0, %v275_v46 }
  0x66   : > { %1535 = vmatmul.mubr.msk.f32.gmra.mrb[4].mxu1 %vm393_vm0, %v275_v46  ;;  %1496 = vmatprep.mubr.msk.f32.mxu0 %vm393_vm0, %v276_v0  ;;  %v278_v46 = vld [vmem:[%s2120_s2 + $0x8] sm:$0xff] }
  0x67   : > { %1536 = vmatprep.mubr.msk.f32.mxu1 %vm393_vm0, %v276_v0 }
  0x69   : > { %1497 = vmatmul.mubr.msk.f32.gmra.mrb[6].mxu0 %vm393_vm0, %v276_v0 }
  0x6a   : > { %1537 = vmatmul.mubr.msk.f32.gmra.mrb[6].mxu1 %vm393_vm0, %v276_v0  ;;  %863 = vmatprep.mubr.f32.mxu0 %v1767_v6 }
  0x6b   : > { %940 = vmatprep.mubr.f32.mxu1 %v1767_v6 }
  0x8f   : > { %v288_v47 = vpop.permute.xlu0 %287  ;;  %v298_v61 = vpop.permute.xlu1 %297 }
  0x93   : > { %v293_v53 = vpop.permute.xlu0 %292  ;;  %v303_v21 = vpop.permute.xlu1 %302 }
 0x130   : > { %v664_v48 = vpop.f32.mrb[0].mxu0 }
 0x131   : > { %v753_v49 = vpop.f32.mrb[0].mxu1  ;;  %v666_v50 = vpop.f32.mrb[1].mxu0  ;;  %v665_v52 = vadd.f32 %v664_v48, %v288_v47 }
 0x132   : > { %v755_v51 = vpop.f32.mrb[1].mxu1  ;;  %v754_v54 = vadd.f32 %v753_v49, %v288_v47  ;;  %v667_v55 = vadd.f32 %v666_v50, %v288_v47  ;;  %v310_v49 = vpop.permute.xlu0 %309 }
 0x133   : > { %v756_v57 = vadd.f32 %v755_v51, %v288_v47  ;;  %v776_v2 = vmax.f32 %v665_v52, 0.0  ;;  %v315_v52 = vpop.permute.xlu1 %314 }
 0x134   : > { %v670_v56 = vpop.f32.mrb[2].mxu0  ;;  %v778_v5 = vmax.f32 %v754_v54, 0.0  ;;  %v777_v7 = vmax.f32 %v667_v55, 0.0 }
 0x135   : > { %v671_v58 = vadd.f32 %v670_v56, %v293_v53  ;;  %v759_v59 = vpop.f32.mrb[2].mxu1  ;;  %v672_v60 = vpop.f32.mrb[3].mxu0  ;;  %v779_v11 = vmax.f32 %v756_v57, 0.0 }
 0x136   : > { %v760_v62 = vadd.f32 %v759_v59, %v293_v53  ;;  %v673_v63 = vadd.f32 %v672_v60, %v293_v53  ;;  %v761_v1 = vpop.f32.mrb[3].mxu1 }
 0x137   : > { %v780_v3 = vmax.f32 %v671_v58, 0.0  ;;  %v762_v4 = vadd.f32 %v761_v1, %v293_v53 }
 0x138   : > { %v782_v8 = vmax.f32 %v760_v62, 0.0  ;;  %v781_v9 = vmax.f32 %v673_v63, 0.0  ;;  %v676_v10 = vpop.f32.mrb[4].mxu0 }
 0x139   : > { %v1636_v12 = vpack.c.bf16 %v780_v3, %v776_v2  ;;  %v783_v13 = vmax.f32 %v762_v4, 0.0  ;;  %v765_v14 = vpop.f32.mrb[4].mxu1  ;;  %v678_v15 = vpop.f32.mrb[5].mxu0  ;;  %v677_v20 = vadd.f32 %v676_v10, %v298_v61 }
 0x13a   : > { %v1644_v16 = vpack.c.bf16 %v782_v8, %v778_v5  ;;  %v1634_v17 = vpack.c.bf16 %v781_v9, %v777_v7  ;;  %v767_v18 = vpop.f32.mrb[5].mxu1  ;;  %v766_v22 = vadd.f32 %v765_v14, %v298_v61  ;;  %v679_v23 = vadd.f32 %v678_v15, %v298_v61  ;;  %v279_v14 = vld [vmem:[%s2121_s3] sm:$0xff]  ;;  %v321_v15 = vpop.permute.xlu0 %320 }
 0x13b   : > { %v1642_v19 = vpack.c.bf16 %v783_v13, %v779_v11  ;;  %v768_v25 = vadd.f32 %v767_v18, %v298_v61  ;;  %v784_v32 = vmax.f32 %v677_v20, 0.0 }
 0x13c   : > { %v682_v24 = vpop.f32.mrb[6].mxu0  ;;  %1635 = vmatprep.subr.bf16.mxu0 %v1634_v17  ;;  %v786_v35 = vmax.f32 %v766_v22, 0.0  ;;  %v785_v36 = vmax.f32 %v679_v23, 0.0 }
 0x13d   : > { %v683_v26 = vadd.f32 %v682_v24, %v303_v21  ;;  %v771_v27 = vpop.f32.mrb[6].mxu1  ;;  %1643 = vmatprep.subr.bf16.mxu1 %v1642_v19  ;;  %v684_v28 = vpop.f32.mrb[7].mxu0  ;;  %1637 = vmatpush1.bf16.msra.mxu0 %v1636_v12  ;;  %v787_v39 = vmax.f32 %v768_v25, 0.0 }
 0x13e   : > { %v772_v29 = vadd.f32 %v771_v27, %v303_v21  ;;  %v685_v30 = vadd.f32 %v684_v28, %v303_v21  ;;  %v773_v31 = vpop.f32.mrb[7].mxu1  ;;  %1645 = vmatpush1.bf16.msra.mxu1 %v1644_v16  ;;  %v280_v27 = vld [vmem:[%s2122_s4] sm:$0x1] }
 0x13f   : > { %v788_v33 = vmax.f32 %v683_v26, 0.0  ;;  %v774_v34 = vadd.f32 %v773_v31, %v303_v21 }
 0x140   : > { %v790_v37 = vmax.f32 %v772_v29, 0.0  ;;  %v789_v38 = vmax.f32 %v685_v30, 0.0  ;;  %v1266_v30 = vlaneseq }
 0x141   : > { %v1640_v40 = vpack.c.bf16 %v788_v33, %v784_v32  ;;  %v791_v41 = vmax.f32 %v774_v34, 0.0  ;;  %v327_v33 = vpop.permute.xlu1 %326 }
 0x142   : > { %v1648_v42 = vpack.c.bf16 %v790_v37, %v786_v35  ;;  %v1638_v43 = vpack.c.bf16 %v789_v38, %v785_v36  ;;  %v1267_v32 = vshrl.u32 %v1266_v30, 7  ;;  %vm1288_vm5 = vcmp.lt.s32.totalorder %v1266_v30, 512 }
 0x143   : > { %v1646_v44 = vpack.c.bf16 %v791_v41, %v787_v39 }
 0x144   : > { %1639 = vmatprep.subr.bf16.mxu0 %v1638_v43 }
 0x145   : > { %1647 = vmatprep.subr.bf16.mxu1 %v1646_v44  ;;  %1641 = vmatpush1.bf16.msra.mxu0 %v1640_v40 }
 0x146   : > { %1649 = vmatpush1.bf16.msra.mxu1 %v1648_v42 }
 0x148   : > { %1444 = vmatmul.mubr.msk.f32.vlgmr.msra.gmra.mrb[8].mxu0 %vm792_vm2, %v277_v45 }
 0x149   : > { %1446 = vmatmul.mubr.msk.f32.vlgmr.msra.gmra.mrb[8].mxu1 %vm792_vm2, %v277_v45  ;;  %869 = vmatprep.mubr.f32.mxu0 %v1767_v6 }
 0x14a   : > { %946 = vmatprep.mubr.f32.mxu1 %v1767_v6 }
 0x14c   : > { %1445 = vmatmul.mubr.msk.f32.gmra.mrb[10].mxu0 %vm792_vm2, %v278_v46 }
 0x14d   : > { %1447 = vmatmul.mubr.msk.f32.gmra.mrb[10].mxu1 %vm792_vm2, %v278_v46  ;;  %1029 = vmatprep.mubr.f32.mxu0 %v1767_v6 }
 0x14e   : > { %1100 = vmatprep.mubr.f32.mxu1 %v1767_v6 }
 0x21b   : > { %v865_v0 = vpop.f32.mrb[8].mxu0 }
 0x21c   : > { %v942_v47 = vpop.f32.mrb[8].mxu1  ;;  %v867_v48 = vpop.f32.mrb[9].mxu0  ;;  %v866_v51 = vadd.f32 %v865_v0, %v310_v49 }
 0x21d   : > { %v944_v50 = vpop.f32.mrb[9].mxu1  ;;  %v943_v53 = vadd.f32 %v942_v47, %v310_v49  ;;  %v868_v54 = vadd.f32 %v867_v48, %v310_v49 }
 0x21e   : > { %v945_v56 = vadd.f32 %v944_v50, %v310_v49  ;;  %v953_v63 = vmax.f32 %v866_v51, 0.0 }
 0x21f   : > { %v871_v55 = vpop.f32.mrb[10].mxu0  ;;  %v955_v3 = vmax.f32 %v943_v53, 0.0  ;;  %v954_v4 = vmax.f32 %v868_v54, 0.0 }
 0x220   : > { %v872_v57 = vadd.f32 %v871_v55, %v315_v52  ;;  %v948_v58 = vpop.f32.mrb[10].mxu1  ;;  %v873_v59 = vpop.f32.mrb[11].mxu0  ;;  %v956_v8 = vmax.f32 %v945_v56, 0.0 }
 0x221   : > { %v949_v60 = vadd.f32 %v948_v58, %v315_v52  ;;  %v874_v61 = vadd.f32 %v873_v59, %v315_v52  ;;  %v950_v62 = vpop.f32.mrb[11].mxu1 }
 0x222   : > { %v957_v1 = vmax.f32 %v872_v57, 0.0  ;;  %v951_v2 = vadd.f32 %v950_v62, %v315_v52 }
 0x223   : > { %v959_v5 = vmax.f32 %v949_v60, 0.0  ;;  %v958_v7 = vmax.f32 %v874_v61, 0.0 }
 0x224   : > { %v1652_v9 = vpack.c.bf16 %v957_v1, %v953_v63  ;;  %v960_v10 = vmax.f32 %v951_v2, 0.0 }
 0x225   : > { %v1656_v11 = vpack.c.bf16 %v959_v5, %v955_v3  ;;  %v1650_v12 = vpack.c.bf16 %v958_v7, %v954_v4 }
 0x226   : > { %v1654_v13 = vpack.c.bf16 %v960_v10, %v956_v8 }
 0x227   : > { %1651 = vmatprep.subr.bf16.mxu0 %v1650_v12 }
 0x228   : > { %1655 = vmatprep.subr.bf16.mxu1 %v1654_v13  ;;  %1653 = vmatpush1.bf16.msra.mxu0 %v1652_v9 }
 0x229   : > { %1657 = vmatpush1.bf16.msra.mxu1 %v1656_v11 }
 0x22b   : > { %1448 = vmatmul.mubr.msk.f32.vlgmr.msra.gmra.mrb[12].mxu0 %vm961_vm3, %v279_v14 }
 0x22c   : > { %1449 = vmatmul.mubr.msk.f32.vlgmr.msra.gmra.mrb[12].mxu1 %vm961_vm3, %v279_v14  ;;  %1179 = vmatprep.mubr.f32.mxu0 %v1767_v6 }
 0x22d   : > { %1250 = vmatprep.mubr.f32.mxu1 %v1767_v6  ;;  %v1768_v6 = vmov 1966171168  }
 0x22e   : > { %v1264_v29 = vunpack.c.l.s4 %v1768_v6 }
 0x230   : > { %v1265_v31 = vunpack.c.0.s8 %v1264_v29 }
 0x232   : > { %v1268_v40 = vsub.s32 %v1265_v31, %v1267_v32 }
 0x2fe   : > { %v1031_v16 = vpop.f32.mrb[12].mxu0 }
 0x2ff   : > { %v1032_v17 = vadd.f32 %v1031_v16, %v321_v15  ;;  %v1102_v18 = vpop.f32.mrb[12].mxu1  ;;  %v1033_v19 = vpop.f32.mrb[13].mxu0 }
 0x300   : > { %v1103_v20 = vadd.f32 %v1102_v18, %v321_v15  ;;  %v1034_v21 = vadd.f32 %v1033_v19, %v321_v15  ;;  %v1104_v22 = vpop.f32.mrb[13].mxu1 }
 0x301   : > { %v1105_v23 = vadd.f32 %v1104_v22, %v321_v15  ;;  %v1107_v25 = vmax.f32 %v1032_v17, 0.0 }
 0x302   : > { %v1108_v24 = vmax.f32 %v1034_v21, 0.0  ;;  %v1109_v28 = vmax.f32 %v1103_v20, 0.0 }
 0x303   : > { %v1110_v26 = vmax.f32 %v1105_v23, 0.0 }
 0x304   : > { %1115 = vmatprep.subr.mxu0 %v1108_v24 }
 0x305   : > { %1186 = vmatprep.subr.mxu1 %v1110_v26  ;;  %1116 = vmatpush1.msra.mxu0 %v1107_v25 }
 0x306   : > { %1187 = vmatpush1.msra.mxu1 %v1109_v28  ;;  %1450 = vmatmul.mubr.msk.f32.vlgmr.msra.gmra.mrb[14].mxu0 %vm1111_vm4, %v280_v27 }
 0x307   : > { %1451 = vmatmul.mubr.msk.f32.vlgmr.msra.gmra.mrb[14].mxu1 %vm1111_vm4, %v280_v27 }
 0x3d9   : > { %v1181_v34 = vpop.f32.mrb[14].mxu0 }
 0x3da   : > { %v1182_v35 = vadd.f32 %v1181_v34, %v327_v33  ;;  %v1252_v36 = vpop.f32.mrb[14].mxu1  ;;  %v1183_v37 = vpop.f32.mrb[15].mxu0 }
 0x3db   : > { %v1253_v38 = vadd.f32 %v1252_v36, %v327_v33  ;;  %v1184_v39 = vadd.f32 %v1183_v37, %v327_v33  ;;  %v1254_v41 = vpop.f32.mrb[15].mxu1 }
 0x3dc   : > { %v1255_v42 = vadd.f32 %v1254_v41, %v327_v33 }
 0x3dd   : > { %v1261_v43 = vcombine.low %v1182_v35, %v1184_v39 }
 0x3de   : > { %v1262_v44 = vcombine.low %v1253_v38, %v1255_v42 }
 0x3df   : > { %v1269_v45 = vrot.slane %v1261_v43, %v1268_v40 }
 0x3e0   : > { %v1276_v46 = vrot.slane %v1262_v44, %v1268_v40 }
 0x3e2   : > { %v1277_v0 = vcombine.low %v1269_v45, %v1276_v46 }
 0x3e4   : > { %v1284_v47 = vrot.slane %v1277_v0, %v1268_v40 }
 0x3e6   : > { %1290 = vst.msk [vmem:[%s257_s19] sm:$0xf] %vm1288_vm5, %v1284_v47 }
 0x3e7   : > { %1715 = shalt.err (!%p1712_p3)
}
 0x3e8   : > { %s1716_s9 = scalar_lea.hbm %s2076_s28, 64  ;;  %s1720_s16 = scalar_lea.hbm %s2124_s6, 128 }
 0x3e9   : > { %p1717_p4 = scmp.ne.s32.totalorder %s2076_s28, %s1716_s9  ;;  %p1721_p9 = scmp.lt.u32.totalorder %s2076_s28, %s2124_s6 }
 0x3ea   : > { %p1722_p10 = scmp.lt.u32.totalorder %s1720_s16, %s1716_s9  ;;  %p1724_p12 = scmp.lt.u32.totalorder %s1716_s9, %s2076_s28 }
 0x3eb   : > { %p1718_p7 = pnand %p1717_p4, %p1840_p5 }
 0x3ec   : > { %p1723_p11 = por %p1722_p10, %p1721_p9 }
 0x3ed   : > { %p1719_p8 = pneg %p1718_p7 }
 0x3ee   : > { %p1725_p13 = por %p1724_p12, %p1723_p11 }
 0x3f0   : > { %p1726_p0 = pnand %p1725_p13, %p1719_p8 }
 0x3f2   : > { %1729 = shalt.err (!%p1726_p0)
}
 0x3f3   : > { %1658 = dma.vmem_to_hbm [thread:$0]  (%p1840_p5), %s2078_s20, 64, %s2076_s28, %s1292_s29  }
 0x3f4 PF: > { %p1664_p1 = scmp.ge.s32.totalorder %s1764_s24, 2  ;;  %s1318_s19 = sand.u32 1, %s1752_s21  }
 0x3f5   : > { %s1319_s25 = scalar_lea.sflag [#allocation3], %s1318_s19 }
 0x3f6   : > { %p1661_p2 = pnand %p1664_p1, %p1844_p6 }
 0x3f8   : > { %1747 = dma.done.wait (!%p1661_p2), %s1319_s25, 64  }
 0x3f9   : > { %1749 = vsyncadd (!%p1661_p2), %s1319_s25, 4294967232  ;;  %p16_p3 = scmp.ge.s32.totalorder %s1828_s27, 4   ;;  %s2129_s21 = smov %s1756_s22 }
 0x3fa   : > { %s2130_s22 = smov %s1760_s23  ;;  %s2131_s23 = smov %s1838_s30 }
 0x3fb   : > { %s2132_s24 = smov %s1828_s27  ;;  %18 = sbr.rel (!%p16_p3) target bundleno = 3 (0x3), region = 79 }
 0x402   :  { %1324 = vsyncpa [#allocation3], 1 }
 0x403   :  { %1326 = vsyncpa [#allocation3 + $0x1], 1 }

</bundles_post_ra>
